<compile_context>
chip_gen: v7x
topology: tpu7x:2x2x1
jax: 0.10.0
libtpu: 0.0.40
codegen_flags: <defaults>
</compile_context>

<pallas_src>
import jax
import jax.numpy as jnp
from jax.experimental import pallas as pl
from jax.experimental.pallas import tpu as pltpu


# ----------------------------- helpers --------------------------------------

def _round_up(x, m):
    return (x + m - 1) // m * m


def _cdiv(a, b):
    return -(-a // b)


def _sublane(itemsize):
    # sublane packing: 8 rows for 32-bit dtypes, 16 for 16-bit dtypes
    return 8 * (4 // itemsize)


def _padded_bytes(rows, cols, itemsize):
    """VMEM footprint of a (rows, cols) buffer after (sublane, 128) padding."""
    return (_round_up(max(rows, 1), _sublane(itemsize))
            * _round_up(max(cols, 1), 128) * itemsize)


# ----------------------------- kernel ----------------------------------------

def freda_kernel(x_ref, mask_ref, w_ref, b_ref, out_ref):
    """One fused tile: x-tile @ [Ws|Wt]-slab, then bias + tanh + mask.

    x_ref    : (tile_m, D_in)    row tile of flattened word representations
    mask_ref : (tile_m, 1)       float mask (1.0 token, 0.0 pad), f32
    w_ref    : (D_in, tile_n)    column slab of the fused weight [Ws | Wt]
    b_ref    : (1, tile_n)       column slab of the fused bias, f32
    out_ref  : (tile_m, tile_n)  output tile (lane-dense: tile_n % 128 == 0)
    """
    acc = jnp.dot(x_ref[...], w_ref[...], preferred_element_type=jnp.float32)
    out = jnp.tanh(acc + b_ref[...]) * mask_ref[...]
    out_ref[...] = out.astype(out_ref.dtype)


# ----------------------------- wrappers ---------------------------------------

def fuse_freda_params(w_shared, b_shared, w_task, b_task,
                      compute_dtype=jnp.bfloat16):
    """Fuse shared + task-specific encoder params into one lane-dense slab.

    Returns (w_cat, b_cat) with the feature dim zero-padded to a multiple of
    128 and the weight cast to `compute_dtype`.  Call once and reuse across
    forward steps (hoisted out of the hot path).
    """
    d_in, d_out = w_shared.shape
    d2 = 2 * d_out
    d2_pad = _round_up(d2, 128)
    w_cat = jnp.concatenate([w_shared, w_task], axis=1)
    b_cat = jnp.concatenate(
        [b_shared.reshape(1, d_out), b_task.reshape(1, d_out)], axis=1)
    if d2_pad != d2:
        # tanh(0 + 0) * mask == 0 in the padded columns -> harmless, sliced off.
        w_cat = jnp.pad(w_cat, ((0, 0), (0, d2_pad - d2)))
        b_cat = jnp.pad(b_cat, ((0, 0), (0, d2_pad - d2)))
    return w_cat.astype(compute_dtype), b_cat.astype(jnp.float32)


def freda_forward_fused(word_rep, mask, w_cat, b_cat, d_out, *,
                        tile_m=1024, out_dtype=None):
    """Pallas-backed Freda.forward(formalism, word_rep, mask) with pre-fused params.

    word_rep: (B, S, D_in) float32/bfloat16
    mask:     (B, S)       float / bool-castable
    w_cat:    (D_in, D2_pad) fused [Ws | Wt] (from fuse_freda_params)
    b_cat:    (1, D2_pad)    fused [bs | bt], f32
    Returns (combined, combined) with combined: (B, S, 2*d_out).
    """
    B, S, d_in = word_rep.shape
    assert w_cat.shape[0] == d_in
    d2 = 2 * d_out
    d2_pad = w_cat.shape[1]
    N = B * S
    compute_dtype = w_cat.dtype
    out_dtype = word_rep.dtype if out_dtype is None else out_dtype
    bpe_c = jnp.dtype(compute_dtype).itemsize
    bpe_o = jnp.dtype(out_dtype).itemsize
    sub = _sublane(bpe_c)

    x_flat = word_rep.reshape(N, d_in).astype(compute_dtype)
    m_flat = mask.astype(jnp.float32).reshape(N, 1)

    # ---- generation-aware VMEM budget (64 MiB v7x, 128 MiB v5e/v6e) --------
    try:
        vmem_cap = int(pltpu.get_tpu_info().vmem_capacity_bytes)
    except Exception:
        vmem_cap = 64 * 1024 * 1024  # conservative fallback (fits all gens)
    budget = max(vmem_cap - 16 * 1024 * 1024, 16 * 1024 * 1024)

    # ---- feature-axis tiling: keep the fused weight resident when it fits,
    #      otherwise stream (D_in, tile_n) column slabs (v7x large-weight case)
    tile_n = d2_pad
    while tile_n > 128 and 2 * _padded_bytes(d_in, tile_n, bpe_c) > budget // 2:
        tile_n = max(128, _round_up(tile_n // 2, 128))
    fixed = (2 * _padded_bytes(d_in, tile_n, bpe_c)       # weight slab (dbl-buffered)
             + 2 * _padded_bytes(1, tile_n, 4))           # bias slab
    avail = max(budget - fixed, 4 * 1024 * 1024)

    # ---- row-axis tiling, sized to the remaining budget ---------------------
    def row_tile_bytes(tm):
        return 2 * (_padded_bytes(tm, d_in, bpe_c)        # x tile
                    + _padded_bytes(tm, 1, 4)             # mask tile
                    + _padded_bytes(tm, tile_n, bpe_o))   # output tile

    tile_m = max(sub, _round_up(min(int(tile_m), N), sub))
    while tile_m > sub and row_tile_bytes(tile_m) > avail:
        tile_m = max(sub, _round_up(tile_m // 2, sub))
    if N >= 2 * sub:
        # Keep >= 2 row steps so the parallel axis can split across the two
        # TensorCores of a v7x megacore (and pipeline on single-TC parts).
        tile_m = min(tile_m, _round_up(_cdiv(N, 2), sub))
    if tile_m >= N:
        tile_m = N  # single block equal to the full row extent (always legal)

    grid = (_cdiv(N, tile_m), _cdiv(d2_pad, tile_n))

    vmem_est = row_tile_bytes(tile_m) + fixed
    vmem_limit = int(min(max(vmem_est + vmem_est // 4, 16 * 1024 * 1024),
                         vmem_cap - 2 * 1024 * 1024))

    combined_flat = pl.pallas_call(
        freda_kernel,
        out_shape=jax.ShapeDtypeStruct((N, d2_pad), out_dtype),
        grid_spec=pltpu.PrefetchScalarGridSpec(
            num_scalar_prefetch=0,
            grid=grid,
            in_specs=[
                pl.BlockSpec((tile_m, d_in), lambda i, j: (i, 0)),   # x rows
                pl.BlockSpec((tile_m, 1), lambda i, j: (i, 0)),      # mask rows
                pl.BlockSpec((d_in, tile_n), lambda i, j: (0, j)),   # weight cols
                pl.BlockSpec((1, tile_n), lambda i, j: (0, j)),      # bias cols
            ],
            out_specs=pl.BlockSpec((tile_m, tile_n), lambda i, j: (i, j)),
        ),
        compiler_params=pltpu.CompilerParams(
            dimension_semantics=("parallel", "parallel"),
            vmem_limit_bytes=vmem_limit,
        ),
    )(x_flat, m_flat, w_cat, b_cat)

    if d2_pad != d2:
        combined_flat = combined_flat[:, :d2]
    combined = combined_flat.reshape(B, S, d2)
    # Freda returns the same tensor for parsing and tagging inputs.
    # TODO(synk): nonzero task_dropout would need an in-kernel pltpu PRNG mask
    # on the task-specific half; the module default p=0.0 is an identity.
    return combined, combined


def freda_forward(word_rep, mask, w_shared, b_shared, w_task, b_task, *,
                  compute_dtype=jnp.bfloat16, tile_m=1024, out_dtype=None):
    """Convenience wrapper (fuses params per call).

    For repeated steps, call fuse_freda_params once and use
    freda_forward_fused directly so the concat/pad/cast is hoisted.
    """
    w_cat, b_cat = fuse_freda_params(w_shared, b_shared, w_task, b_task,
                                     compute_dtype=compute_dtype)
    return freda_forward_fused(word_rep, mask, w_cat, b_cat,
                               w_shared.shape[1], tile_m=tile_m,
                               out_dtype=out_dtype)


# ----------------------------- reference & test -------------------------------

def _reference(word_rep, mask, w_shared, b_shared, w_task, b_task):
    m = mask.astype(jnp.float32)[..., None]
    shared = jnp.tanh(word_rep @ w_shared + b_shared) * m
    specific = jnp.tanh(word_rep @ w_task + b_task) * m
    combined = jnp.concatenate([shared, specific], axis=2)
    return combined, combined


if __name__ == "__main__":
    key = jax.random.PRNGKey(0)

    # --- Test 1: module-like small shapes ------------------------------------
    B, S, D_in, D_out = 2, 8, 32, 32
    k1, k2, k3, k4, k5 = jax.random.split(key, 5)
    word_rep = jax.random.normal(k1, (B, S, D_in), dtype=jnp.float32)
    mask = jnp.ones((B, S), dtype=jnp.float32).at[1, -2:].set(0.0)
    w_shared = jax.random.normal(k2, (D_in, D_out), dtype=jnp.float32) * 0.1
    b_shared = jax.random.normal(k3, (D_out,), dtype=jnp.float32) * 0.01
    w_task = jax.random.normal(k4, (D_in, D_out), dtype=jnp.float32) * 0.1
    b_task = jax.random.normal(k5, (D_out,), dtype=jnp.float32) * 0.01

    ref_parse, _ = _reference(word_rep, mask, w_shared, b_shared, w_task, b_task)

    # f32 compute path: matches the PyTorch module tightly.
    w32, b32 = fuse_freda_params(w_shared, b_shared, w_task, b_task,
                                 compute_dtype=jnp.float32)
    p32, t32 = freda_forward_fused(word_rep, mask, w32, b32, D_out)
    jax.block_until_ready(p32)
    assert p32.shape == (B, S, 2 * D_out)
    assert jnp.allclose(p32, ref_parse, atol=1e-5, rtol=1e-5)
    assert jnp.array_equal(p32, t32)

    # bf16 compute path (default fast path): f32 MXU accumulate, looser tol.
    wbf, bbf = fuse_freda_params(w_shared, b_shared, w_task, b_task,
                                 compute_dtype=jnp.bfloat16)
    pbf, _ = freda_forward_fused(word_rep, mask, wbf, bbf, D_out)
    jax.block_until_ready(pbf)
    assert jnp.allclose(pbf, ref_parse, atol=2e-2, rtol=2e-2)

    # --- Test 2: ragged rows (N not a tile multiple) + column padding --------
    B2, S2, Di2, Do2 = 5, 7, 40, 48     # N = 35 rows, combined dim 96 -> pad 128
    kk = jax.random.split(jax.random.PRNGKey(1), 5)
    wr2 = jax.random.normal(kk[0], (B2, S2, Di2), dtype=jnp.float32)
    mk2 = jnp.ones((B2, S2), dtype=jnp.float32).at[0, -3:].set(0.0)
    ws2 = jax.random.normal(kk[1], (Di2, Do2), dtype=jnp.float32) * 0.1
    bs2 = jax.random.normal(kk[2], (Do2,), dtype=jnp.float32) * 0.01
    wt2 = jax.random.normal(kk[3], (Di2, Do2), dtype=jnp.float32) * 0.1
    bt2 = jax.random.normal(kk[4], (Do2,), dtype=jnp.float32) * 0.01
    ref2, _ = _reference(wr2, mk2, ws2, bs2, wt2, bt2)
    p2, t2 = freda_forward(wr2, mk2, ws2, bs2, wt2, bt2,
                           compute_dtype=jnp.float32, tile_m=16)
    jax.block_until_ready(p2)
    assert p2.shape == (B2, S2, 2 * Do2)
    assert jnp.allclose(p2, ref2, atol=1e-5, rtol=1e-5)
    assert jnp.array_equal(p2, t2)

    print("KERNEL_OK")
</pallas_src>

<mosaic_0001>
module attributes {stable_mosaic.version = 11 : i64} {
  func.func @freda_kernel(%arg0: i32, %arg1: i32, %arg2: memref<8x32xf32, #tpu.memory_space<vmem>>, %arg3: memref<8x1xf32, #tpu.memory_space<vmem>>, %arg4: memref<32x128xf32, #tpu.memory_space<vmem>>, %arg5: memref<1x128xf32, #tpu.memory_space<vmem>>, %arg6: memref<8x128xf32, #tpu.memory_space<vmem>>) attributes {dimension_semantics = [#tpu.dimension_semantics<parallel>, #tpu.dimension_semantics<parallel>], iteration_bounds = array<i64: 2, 1>, scalar_prefetch = 0 : i64, scratch_operands = 0 : i64, tpu.core_type = #tpu.core_type<tc>, window_params = [{transform_indices = @transform_0, window_bounds = array<i64: 8, 32>}, {transform_indices = @transform_1, window_bounds = array<i64: 8, 1>}, {transform_indices = @transform_2, window_bounds = array<i64: 32, 128>}, {transform_indices = @transform_3, window_bounds = array<i64: 1, 128>}, {transform_indices = @transform_4, window_bounds = array<i64: 8, 128>}]} {
    %c0 = arith.constant 0 : index
    %c0_0 = arith.constant 0 : index
    %0 = vector.load %arg2[%c0, %c0_0] : memref<8x32xf32, #tpu.memory_space<vmem>>, vector<8x32xf32>
    %c0_1 = arith.constant 0 : index
    %c0_2 = arith.constant 0 : index
    %1 = vector.load %arg4[%c0_1, %c0_2] : memref<32x128xf32, #tpu.memory_space<vmem>>, vector<32x128xf32>
    %cst = arith.constant dense<0.000000e+00> : vector<8x128xf32>
    %2 = tpu.matmul %0, %1, %cst {dimension_numbers = #tpu.dot_dimension_numbers<[1], [0], [0], [1], [0, 0, 1, 1], [], []>} : vector<8x32xf32>, vector<32x128xf32>, vector<8x128xf32> -> vector<8x128xf32>
    %c0_3 = arith.constant 0 : index
    %c0_4 = arith.constant 0 : index
    %3 = vector.load %arg5[%c0_3, %c0_4] : memref<1x128xf32, #tpu.memory_space<vmem>>, vector<1x128xf32>
    %4 = vector.broadcast %3 : vector<1x128xf32> to vector<8x128xf32>
    %5 = arith.addf %2, %4 : vector<8x128xf32>
    %6 = math.tanh %5 : vector<8x128xf32>
    %c0_5 = arith.constant 0 : index
    %c0_6 = arith.constant 0 : index
    %7 = vector.load %arg3[%c0_5, %c0_6] : memref<8x1xf32, #tpu.memory_space<vmem>>, vector<8x1xf32>
    %8 = vector.broadcast %7 : vector<8x1xf32> to vector<8x128xf32>
    %9 = arith.mulf %6, %8 : vector<8x128xf32>
    %c0_7 = arith.constant 0 : index
    %c0_8 = arith.constant 0 : index
    %10 = vector.load %arg6[%c0_7, %c0_8] : memref<8x128xf32, #tpu.memory_space<vmem>>, vector<8x128xf32>
    tpu.vector_store %arg6[%c0_7, %c0_8], %9 {strides = array<i32>} : memref<8x128xf32, #tpu.memory_space<vmem>>, vector<8x128xf32>,
    return
  }
  func.func @transform_0(%arg0: i32, %arg1: i32) -> (i32, i32) {
    %c0_i32 = arith.constant 0 : i32
    %c0_i32_0 = arith.constant 0 : i32
    return %arg0, %c0_i32 : i32, i32
  }
  func.func @transform_1(%arg0: i32, %arg1: i32) -> (i32, i32) {
    %c0_i32 = arith.constant 0 : i32
    %c0_i32_0 = arith.constant 0 : i32
    return %arg0, %c0_i32 : i32, i32
  }
  func.func @transform_2(%arg0: i32, %arg1: i32) -> (i32, i32) {
    %c0_i32 = arith.constant 0 : i32
    %c0_i32_0 = arith.constant 0 : i32
    return %c0_i32, %arg1 : i32, i32
  }
  func.func @transform_3(%arg0: i32, %arg1: i32) -> (i32, i32) {
    %c0_i32 = arith.constant 0 : i32
    %c0_i32_0 = arith.constant 0 : i32
    return %c0_i32, %arg1 : i32, i32
  }
  func.func @transform_4(%arg0: i32, %arg1: i32) -> (i32, i32) {
    %c0_i32 = arith.constant 0 : i32
    return %arg0, %arg1 : i32, i32
  }
}

</mosaic_0001>

<bundles_post_ra>
// kernel: tpu_custom_call.1
= control target key start
LH: loop header
LB: loop body
LE: loop exit
PB: predicated region body
PF: predicated region fallthrough
CT: control target
= control target key end

     0   :  { %9 = vsyncpa [#allocation3], 0  ;;  %s891_s0 = inlined_call_operand.vmem [shape: f32[16,32], index: 0, kind: input, shape index: {}]   ;;  %s892_s1 = inlined_call_operand.vmem [shape: f32[16,1], index: 1, kind: input, shape index: {}]   ;;  %s893_s2 = inlined_call_operand.hbm [shape: f32[32,128], index: 2, kind: input, shape index: {}]   ;;  %s894_s3 = inlined_call_operand.vmem [shape: f32[1,128], index: 3, kind: input, shape index: {}]   ;;  %s895_s4 = inlined_call_operand.hbm [shape: f32[16,128], index: 4, kind: output, shape index: {}]  }
   0x1   :  { %10 = vsyncpa [#allocation4], 0 }
   0x2   :  { %12 = vsyncpa [#allocation4 + $0x1], 0  ;;  %s735_s15 = smov 0   ;;  %s737_s16 = smov 0  }
   0x3   :  { %s739_s17 = smov 0   ;;  %s741_s18 = smov 0  }
   0x4   :  { %s743_s19 = smov 0   ;;  %s745_s20 = smov 0  }
   0x5 LB: > { %s476_s21 = sadd.s32 4294967295, %s700_s20   ;;  %s477_s22 = sadd.s32 4294967294, %s700_s20   ;;  %s700_s20 = sphi %s745_s20, %s18_s20   ;;  %s696_s19 = sphi %s743_s19, %s913_s19   ;;  %s692_s18 = sphi %s741_s18, %s912_s18   ;;  %s688_s17 = sphi %s739_s17, %s911_s17   ;;  %s684_s16 = sphi %s737_s16, %s910_s16   ;;  %s680_s15 = sphi %s735_s15, %s909_s15  }
   0x6   : > { %s30_s23 = sadd.s32 1, %s696_s19  ;;  %s143_s24 = sadd.s32 1, %s688_s17 }
   0x7   : > { %p32_p0 = scmp.ge.s32.totalorder %s30_s23, 2  ;;  %p153_p1 = scmp.ne.s32.totalorder %s688_s17, %s684_s16 }
   0x8   : > { %p154_p2 = scmp.eq.s32.totalorder %s476_s21, 1  ;;  %p159_p3 = scmp.ne.s32.totalorder %s684_s16, %s680_s15 }
   0x9   : > { %s915_s23 = smov (%p32_p0, %s30_s23), 0  ;;  %p160_p5 = scmp.eq.s32.totalorder %s477_s22, 1 }
   0xa   : > { %p775_p4 = por %p154_p2, %p153_p1  ;;  %s138_s26 = ssub.s32 %s696_s19, %s915_s23 }
   0xb   : > { %p478_p6 = scmp.ge.s32.totalorder %s700_s20, 1  ;;  %p141_p7 = scmp.eq.s32.totalorder %s138_s26, 0 }
   0xc   : > { %s900_s25 = scalar_select %p775_p4, 1, 0 }
   0xd   : > { %p782_p8 = por %p160_p5, %p159_p3  ;;  %p167_p9 = scmp.lt.s32.totalorder %s700_s20, 3 }
   0xe   : > { %s788_s28 = scalar_select %p141_p7, %s688_s17, %s143_s24  }
   0xf   : > { %s901_s27 = scalar_select %p782_p8, 1, 0 }
  0x10   : > { %p790_p10 = pnand %p478_p6, %p167_p9  ;;  %p794_p11 = scmp.eq.s32.totalorder %s476_s21, 0 }
  0x11   : > { %s702_s5 = smov [#allocation2]   ;;  %s590_s10 = scalar_lea.hbm %s893_s2, 512 }
  0x12   : > { %s902_s29 = scalar_select %p790_p10, 1, 0 }
  0x13   : > { %s903_s30 = scalar_select %p794_p11, 1, 0 }
  0x14   : > { %p521_p12 = pneg %p790_p10  ;;  %s181_s6 = sshll.u32 %s702_s5, 4  ;;  %s182_s6 = int_to_ptr.vmem [resolvable:$true] %s181_s6 }
  0x15   : > { %p591_p0 = scmp.ne.s32.totalorder %s893_s2, %s590_s10  ;;  %p597_p5 = scmp.lt.u32.totalorder %s590_s10, %s893_s2 }
  0x16   : > { %p802_p13 = pnand %p794_p11, %p521_p12 }
  0x18   : > { %p592_p1 = pneg %p802_p13 }
  0x1a   : > { %p593_p2 = pnand %p592_p1, %p591_p0 }
  0x1c   : > { %p594_p3 = pneg %p593_p2 }
  0x1e   : > { %p599_p6 = pnand %p597_p5, %p594_p3 }
  0x20   : > { %602 = shalt.err (!%p599_p6)
}
  0x21   : > { %s603_s21 = scalar_lea.vmem %s182_s6, 512  ;;  %p611_p8 = scmp.lt.s32.totalorder %s182_s6, %s182_s6 }
  0x22   : > { %p604_p7 = scmp.ne.s32.totalorder %s182_s6, %s603_s21  ;;  %p612_p4 = scmp.lt.s32.totalorder %s603_s21, %s603_s21 }
  0x24   : > { %p606_p9 = pnand %p604_p7, %p592_p1  ;;  %p613_p11 = por %p612_p4, %p611_p8 }
  0x26   : > { %p607_p12 = pneg %p606_p9 }
  0x28   : > { %p614_p10 = pnand %p613_p11, %p607_p12 }
  0x2a   : > { %617 = shalt.err (!%p614_p10)
}
  0x2b   : > { %s703_s22 = smov 128   ;;  %s704_s24 = smov 8  }
  0x2c   : > { %524 = dma.hbm_to_vmem [thread:$0]  (!%p802_p13), %s893_s2, 512, %s182_s6, [#allocation3], %s703_s22, %s703_s22, %s704_s24  }
  0x2d   : > { %p905_p0 = scmp.ne.s32.totalorder %s902_s29, 0 }
  0x2e   : > { %p906_p2 = scmp.ne.s32.totalorder (!%p905_p0), %s903_s30, 0 }
  0x2f   : > { %217 = sbr.rel (%p905_p0) target bundleno = 307 (0x133), region = 36 }
  0x36   : > { %671 = dma.done.wait (%p906_p2), [#allocation3], 512  }
  0x37   : > { %673 = vsyncadd (%p906_p2), [#allocation3], 4294966784  ;;  %p249_p4 = scmp.lt.s32.totalorder %s692_s18, 1  ;;  %v705_v0 = vmov 0.0|0.0   ;;  %vm706_vm0 = vmmov 0   ;;  %v707_v1 = vmov 0.0  }
  0x38   : > { %509 = vmatprep.subr.bf16.mxu0 %v705_v0  ;;  %506 = vmatprep.mubr.msk.f32.mxu0 %vm706_vm0, %v707_v1  ;;  %v708_v2 = vmov 0   ;;  %v261_v3 = vld [vmem:[#allocation2] sm:$0xff]  ;;  %v262_v4 = vld [vmem:[#allocation2 + $0x8] sm:$0xff]  ;;  %v263_v5 = vld [vmem:[#allocation2 + $0x10] sm:$0xff]  ;;  %vm272_vm1 = vcmask 261120   ;;  %s246_s14 = sand.u32 1, %s684_s16  }
  0x39   : > { %s250_s7 = scalar_select %p249_p4, %s692_s18, 1  ;;  %587 = vset.pattern.permute.xlu0 %v708_v2  ;;  %v510_v6 = vpack.c.bf16 %v262_v4, %v261_v3  ;;  %v264_v7 = vld [vmem:[#allocation2 + $0x18] sm:$0xff]  ;;  %v487_v11 = vld [vmem:[%s894_s3] ss:$0 sm:$0xff] }
  0x3a   : > { %v513_v9 = vpack.c.bf16 %v264_v7, %v263_v5  ;;  %s484_s21 = sshll.u32 %s246_s14, 3  ;;  %s490_s22 = sshll.u32 %s692_s18, 7 }
  0x3b   : > { %s485_s6 = sshll.u32 %s250_s7, 3  ;;  %511 = vmatpush3.bf16.msra.mxu0 %v510_v6  ;;  %s248_s24 = scalar_lea.vmem [#allocation5], %s484_s21 }
  0x3c   : > { %s256_s9 = scalar_lea.vmem %s892_s1, %s485_s6  ;;  %512 = vmatprep.subr.bf16.mxu0 %v705_v0  ;;  %s252_s11 = scalar_lea.vmem %s891_s0, %s485_s6 }
  0x3d   : > { %v347_v8 = vld [vmem:[%s256_s9] sm:$0xff]  ;;  %s370_s26 = sshll.u32 %s248_s24, 4  ;;  %s844_s6 = scalar_lea.hbm %s895_s4, %s490_s22  ;;  %s846_s26 = int_to_ptr.vmem [resolvable:$true] %s370_s26 }
  0x3e   : > { %350 = vperm.xlu0 %587, %v347_v8   ;;  %v260_v10 = vld [vmem:[%s252_s11] sm:$0xff]  ;;  %s356_s29 = scalar_lea.sflag [#allocation4], %s246_s14  ;;  %s618_s8 = scalar_lea.vmem %s846_s26, 128 }
  0x3f   : > { %514 = vmatpush3.bf16.msra.mxu0 %v513_v9  ;;  %p619_p8 = scmp.ne.s32.totalorder %s846_s26, %s618_s8  ;;  %p907_p10 = scmp.ne.s32.totalorder %s900_s25, 0 }
  0x40   : > { %s709_s18 = smov [#allocation5]  }
  0x41   : > { %p620_p11 = pnand %p619_p8, %p907_p10  ;;  %s622_s9 = sshll.u32 %s709_s18, 4  ;;  %s623_s9 = int_to_ptr.vmem [resolvable:$false] %s622_s9 }
  0x42   : > { %507 = vmatmul.mubr.msk.f32.vlgmr.msra.gmra.mrb[0].mxu0 %vm272_vm1, %v260_v10  ;;  %s624_s30 = scalar_lea.vmem %s623_s9, 256  ;;  %p625_p1 = scmp.lt.s32.totalorder %s846_s26, %s623_s9 }
  0x43   : > { %p621_p13 = pneg %p620_p11  ;;  %p626_p3 = scmp.lt.s32.totalorder %s624_s30, %s618_s8 }
  0x45   : > { %p627_p5 = por %p626_p3, %p625_p1 }
  0x47   : > { %p628_p6 = pnand %p627_p5, %p621_p13 }
  0xbd   : > { %v351_v15 = vpop.permute.xlu0 %350 }
 0x115   : > { %v342_v12 = vpop.f32.mrb[0].mxu0 }
 0x116   : > { %v343_v13 = vadd.f32 %v487_v11, %v342_v12  ;;  %v508_v14 = vpop.f32.mrb[1].mxu0 }
 0x118   : > { %588 = vtanh.f32 %v343_v13 }
 0x122   : > { %v589_v16 = vpop.eup %588 }
 0x123   : > { %v353_v17 = vmul.f32 %v589_v16, %v351_v15 }
 0x125   : > { %354 = vst [vmem:[%s248_s24] sm:$0xff] %v353_v17 }
 0x126   : > { %631 = shalt.err (!%p628_p6)
}
 0x127   : > { %s632_s10 = scalar_lea.hbm %s844_s6, 128  ;;  %s636_s13 = scalar_lea.hbm %s895_s4, 256 }
 0x128   : > { %p633_p7 = scmp.ne.s32.totalorder %s844_s6, %s632_s10  ;;  %p637_p0 = scmp.lt.u32.totalorder %s844_s6, %s895_s4 }
 0x129   : > { %p638_p2 = scmp.lt.u32.totalorder %s636_s13, %s632_s10  ;;  %p640_p8 = scmp.lt.u32.totalorder %s632_s10, %s844_s6 }
 0x12a   : > { %p634_p9 = pnand %p633_p7, %p907_p10 }
 0x12b   : > { %p639_p4 = por %p638_p2, %p637_p0 }
 0x12c   : > { %p635_p12 = pneg %p634_p9 }
 0x12d   : > { %p641_p11 = por %p640_p8, %p639_p4 }
 0x12f   : > { %p642_p13 = pnand %p641_p11, %p635_p12 }
 0x131   : > { %645 = shalt.err (!%p642_p13)
}
 0x132   : > { %519 = dma.vmem_to_hbm [thread:$0]  (%p907_p10), %s846_s26, 128, %s844_s6, %s356_s29  }
 0x133 PF: > { %p531_p1 = scmp.ge.s32.totalorder %s700_s20, 2  ;;  %s382_s22 = sand.u32 1, %s680_s15  }
 0x134   : > { %p908_p3 = scmp.ne.s32.totalorder %s901_s27, 0  ;;  %s383_s24 = scalar_lea.sflag [#allocation4], %s382_s22 }
 0x136   : > { %p526_p5 = pnand %p531_p1, %p908_p3 }
 0x138   : > { %675 = dma.done.wait (!%p526_p5), %s383_s24, 128  }
 0x139   : > { %677 = vsyncadd (!%p526_p5), %s383_s24, 4294967168  ;;  %s18_s20 = sadd.s32 1, %s700_s20   ;;  %s909_s15 = smov %s684_s16 }
 0x13a   : > { %p15_p6 = scmp.ge.s32.totalorder %s18_s20, 4   ;;  %s910_s16 = smov %s688_s17 }
 0x13b   : > { %s911_s17 = smov %s788_s28  ;;  %s912_s18 = smov %s696_s19 }
 0x13c   : > { %s913_s19 = smov %s915_s23  ;;  %17 = sbr.rel (!%p15_p6) target bundleno = 5 (0x5), region = 83 }
 0x143   :  { %388 = vsyncpa [#allocation3], 1 }
 0x144   :  { %390 = vsyncpa [#allocation3 + $0x1], 1 }
 0x145   :  { %391 = vsyncpa [#allocation4], 1 }
 0x146   :  { %393 = vsyncpa [#allocation4 + $0x1], 1 }

</bundles_post_ra>
